<compile_context>
chip_gen: v7x
topology: tpu7x:2x2x1
jax: 0.10.0
libtpu: 0.0.40
codegen_flags: <defaults>
</compile_context>

<pallas_src>
import functools

import jax
import jax.numpy as jnp
from jax.experimental import pallas as pl
from jax.experimental.pallas import tpu as pltpu

IN_DIM = 50
IN_PAD = 64        # contraction dim padded for clean MXU / vreg layout
HIDDEN = 512
OUT_DIM = 10
OUT_PAD = 128      # lane-dense padded output width
BN_EPS = 1e-5
STATS_ROWS = 8     # sublane-aligned stats slab (row 0 = sum, row 1 = sum of squares)


def hidden_kernel(x_ref, w1_ref, b1_ref, w2_ref, h2_ref, stats_ref, *, batch, padded):
    """Linear(50->512)+ReLU, Linear(512->512) (b2 dropped: cancels under BatchNorm),
    plus per-tile BatchNorm partial statistics."""
    h1 = jnp.dot(x_ref[...], w1_ref[...],
                 preferred_element_type=jnp.float32) + b1_ref[...]
    h1 = jnp.maximum(h1, 0.0)
    h2 = jnp.dot(h1.astype(jnp.bfloat16), w2_ref[...],
                 preferred_element_type=jnp.float32)
    h2_ref[...] = h2

    tb = h2.shape[0]
    if padded == batch:
        h2m = h2
    else:
        # Mask padded batch rows out of the statistics.
        row = pl.program_id(0) * tb + jax.lax.broadcasted_iota(jnp.int32, (tb, 1), 0)
        h2m = h2 * (row < batch).astype(jnp.float32)
    s = jnp.sum(h2m, axis=0, keepdims=True)           # (1, HIDDEN)
    sq = jnp.sum(h2m * h2m, axis=0, keepdims=True)    # (1, HIDDEN)
    pad = jnp.zeros((STATS_ROWS - 2, HIDDEN), jnp.float32)
    stats_ref[...] = jnp.concatenate([s, sq, pad], axis=0)[None]


def output_kernel(h2_ref, stats_ref, gamma_ref, beta_ref, w3_ref, b3_ref, o_ref, *, batch):
    """BatchNorm1d (training-mode, full-batch stats) + ReLU + Linear(512->10 padded to 128)."""
    inv_b = 1.0 / batch
    s = stats_ref[0:1, :]
    sq = stats_ref[1:2, :]
    mean = s * inv_b
    var = jnp.maximum(sq * inv_b - mean * mean, 0.0)   # cancellation guard
    scale = gamma_ref[...] * jax.lax.rsqrt(var + BN_EPS)
    shift = beta_ref[...] - mean * scale
    h = jnp.maximum(h2_ref[...] * scale + shift, 0.0)
    out = jnp.dot(h.astype(jnp.bfloat16), w3_ref[...],
                  preferred_element_type=jnp.float32) + b3_ref[...]
    o_ref[...] = out.astype(o_ref.dtype)


def prepare_params(params):
    """Cast matmul weights to bf16, pad w1's contraction dim to 64 and the last layer
    to 128 output lanes, and drop b2 (it cancels under training-mode BatchNorm)."""
    w1, b1, w2, b2, gamma, beta, w3, b3 = params
    del b2
    w1p = jnp.zeros((IN_PAD, HIDDEN), jnp.float32).at[:IN_DIM, :].set(w1)
    w3p = jnp.zeros((HIDDEN, OUT_PAD), jnp.float32).at[:, :OUT_DIM].set(w3)
    b3p = jnp.zeros((1, OUT_PAD), jnp.float32).at[:, :OUT_DIM].set(b3)
    return (w1p.astype(jnp.bfloat16), b1, w2.astype(jnp.bfloat16),
            gamma, beta, w3p.astype(jnp.bfloat16), b3p)


def mlp_forward(x, prepped):
    w1p, b1, w2, gamma, beta, w3p, b3p = prepped
    B = x.shape[0]

    # Sublane-aligned batch tile: big enough to feed the MXU at large B,
    # capped at 512 rows so the f32 h2 tile stays well inside v7x's 64 MiB VMEM.
    tb = min(512, ((B + 7) // 8) * 8)
    nb = (B + tb - 1) // tb
    b_pad = nb * tb

    xp = jnp.zeros((b_pad, IN_PAD), jnp.bfloat16).at[:B, :IN_DIM].set(
        x.astype(jnp.bfloat16))

    cparams = pltpu.CompilerParams(
        dimension_semantics=("parallel",),        # megacore sharding on v7x
        vmem_limit_bytes=32 * 1024 * 1024,
    )

    # ---- Pass 1: h1/h2 matmuls + BN partial statistics, weights VMEM-resident ----
    flops1 = 2 * b_pad * (IN_PAD * HIDDEN + HIDDEN * HIDDEN)
    bytes1 = (b_pad * IN_PAD * 2 + IN_PAD * HIDDEN * 2 + HIDDEN * 4
              + HIDDEN * HIDDEN * 2 + b_pad * HIDDEN * 4
              + nb * STATS_ROWS * HIDDEN * 4)
    h2, stats = pl.pallas_call(
        functools.partial(hidden_kernel, batch=B, padded=b_pad),
        grid=(nb,),
        in_specs=[
            pl.BlockSpec((tb, IN_PAD), lambda i: (i, 0)),
            pl.BlockSpec((IN_PAD, HIDDEN), lambda i: (0, 0)),
            pl.BlockSpec((1, HIDDEN), lambda i: (0, 0)),
            pl.BlockSpec((HIDDEN, HIDDEN), lambda i: (0, 0)),
        ],
        out_specs=(
            pl.BlockSpec((tb, HIDDEN), lambda i: (i, 0)),
            pl.BlockSpec((1, STATS_ROWS, HIDDEN), lambda i: (i, 0, 0)),
        ),
        out_shape=(
            jax.ShapeDtypeStruct((b_pad, HIDDEN), jnp.float32),
            jax.ShapeDtypeStruct((nb, STATS_ROWS, HIDDEN), jnp.float32),
        ),
        compiler_params=cparams,
        cost_estimate=pl.CostEstimate(flops=flops1, transcendentals=0,
                                      bytes_accessed=bytes1),
    )(xp, w1p, b1, w2)

    # Cross-tile reduction of BN statistics (tiny) -> full-batch stats stay exact.
    stats_tot = jnp.sum(stats, axis=0)               # (STATS_ROWS, HIDDEN)

    # ---- Pass 2: BatchNorm + ReLU + padded Linear(512 -> 128), lane-dense stores ----
    flops2 = 2 * b_pad * HIDDEN * OUT_PAD
    bytes2 = (b_pad * HIDDEN * 4 + STATS_ROWS * HIDDEN * 4 + 2 * HIDDEN * 4
              + HIDDEN * OUT_PAD * 2 + OUT_PAD * 4 + b_pad * OUT_PAD * 4)
    out_padded = pl.pallas_call(
        functools.partial(output_kernel, batch=B),
        grid=(nb,),
        in_specs=[
            pl.BlockSpec((tb, HIDDEN), lambda i: (i, 0)),
            pl.BlockSpec((STATS_ROWS, HIDDEN), lambda i: (0, 0)),
            pl.BlockSpec((1, HIDDEN), lambda i: (0, 0)),
            pl.BlockSpec((1, HIDDEN), lambda i: (0, 0)),
            pl.BlockSpec((HIDDEN, OUT_PAD), lambda i: (0, 0)),
            pl.BlockSpec((1, OUT_PAD), lambda i: (0, 0)),
        ],
        out_specs=pl.BlockSpec((tb, OUT_PAD), lambda i: (i, 0)),
        out_shape=jax.ShapeDtypeStruct((b_pad, OUT_PAD), jnp.float32),
        compiler_params=cparams,
        cost_estimate=pl.CostEstimate(flops=flops2, transcendentals=nb * HIDDEN,
                                      bytes_accessed=bytes2),
    )(h2, stats_tot, gamma, beta, w3p, b3p)

    return out_padded[:B, :OUT_DIM]


def init_params(key):
    """Deterministic PyTorch-like init: U(-1/sqrt(fan_in), 1/sqrt(fan_in)), f32."""
    def linear(key, fan_in, fan_out):
        kw, kb = jax.random.split(key)
        bound = 1.0 / jnp.sqrt(fan_in)
        w = jax.random.uniform(kw, (fan_in, fan_out), jnp.float32, -bound, bound)
        b = jax.random.uniform(kb, (1, fan_out), jnp.float32, -bound, bound)
        return w, b

    k1, k2, k3 = jax.random.split(key, 3)
    w1, b1 = linear(k1, IN_DIM, HIDDEN)
    w2, b2 = linear(k2, HIDDEN, HIDDEN)
    w3, b3 = linear(k3, HIDDEN, OUT_DIM)
    gamma = jnp.ones((1, HIDDEN), jnp.float32)   # BatchNorm1d weight
    beta = jnp.zeros((1, HIDDEN), jnp.float32)   # BatchNorm1d bias
    return (w1, b1, w2, b2, gamma, beta, w3, b3)


def mlp_ref(x, params):
    """Pure-JAX f32 reference (matches the PyTorch module in train mode, incl. b2)."""
    w1, b1, w2, b2, gamma, beta, w3, b3 = params
    h = jnp.maximum(x @ w1 + b1, 0.0)
    h = h @ w2 + b2
    m = jnp.mean(h, axis=0, keepdims=True)
    v = jnp.mean((h - m) ** 2, axis=0, keepdims=True)
    h = (h - m) / jnp.sqrt(v + BN_EPS) * gamma + beta
    h = jnp.maximum(h, 0.0)
    return h @ w3 + b3


if __name__ == "__main__":
    key = jax.random.PRNGKey(0)
    kx, kp = jax.random.split(key)

    B = 8
    x = jax.random.normal(kx, (B, IN_DIM), jnp.float32)
    params = init_params(kp)
    prepped = prepare_params(params)

    out = mlp_forward(x, prepped)
    out = jax.block_until_ready(out)

    ref = mlp_ref(x, params)
    assert out.shape == (B, OUT_DIM)
    # bf16 matmul operands vs f32 reference -> loosened tolerance.
    assert jnp.allclose(out, ref, atol=3e-2, rtol=3e-2), "mismatch vs reference"

    print("KERNEL_OK")
</pallas_src>

<mosaic_0001>
module attributes {stable_mosaic.version = 11 : i64} {
  func.func @hidden_kernel(%arg0: i32, %arg1: memref<8x64xbf16, #tpu.memory_space<vmem>>, %arg2: memref<64x512xbf16, #tpu.memory_space<vmem>>, %arg3: memref<1x512xf32, #tpu.memory_space<vmem>>, %arg4: memref<512x512xbf16, #tpu.memory_space<vmem>>, %arg5: memref<8x512xf32, #tpu.memory_space<vmem>>, %arg6: memref<1x8x512xf32, #tpu.memory_space<vmem>>) attributes {dimension_semantics = [#tpu.dimension_semantics<parallel>], iteration_bounds = array<i64: 1>, scalar_prefetch = 0 : i64, scratch_operands = 0 : i64, tpu.core_type = #tpu.core_type<tc>, window_params = [{transform_indices = @transform_0, window_bounds = array<i64: 8, 64>}, {pipeline_mode = #tpu.pipeline_mode<synchronous>, transform_indices = @transform_1, window_bounds = array<i64: 64, 512>}, {pipeline_mode = #tpu.pipeline_mode<synchronous>, transform_indices = @transform_2, window_bounds = array<i64: 1, 512>}, {pipeline_mode = #tpu.pipeline_mode<synchronous>, transform_indices = @transform_3, window_bounds = array<i64: 512, 512>}, {transform_indices = @transform_4, window_bounds = array<i64: 8, 512>}, {transform_indices = @transform_5, window_bounds = array<i64: 1, 8, 512>}]} {
    %c0 = arith.constant 0 : index
    %c0_0 = arith.constant 0 : index
    %0 = vector.load %arg1[%c0, %c0_0] : memref<8x64xbf16, #tpu.memory_space<vmem>>, vector<8x64xbf16>
    %c0_1 = arith.constant 0 : index
    %c0_2 = arith.constant 0 : index
    %1 = vector.load %arg2[%c0_1, %c0_2] : memref<64x512xbf16, #tpu.memory_space<vmem>>, vector<64x512xbf16>
    %cst = arith.constant dense<0.000000e+00> : vector<8x512xf32>
    %2 = tpu.matmul %0, %1, %cst {dimension_numbers = #tpu.dot_dimension_numbers<[1], [0], [0], [1], [0, 0, 1, 1], [], []>} : vector<8x64xbf16>, vector<64x512xbf16>, vector<8x512xf32> -> vector<8x512xf32>
    %c0_3 = arith.constant 0 : index
    %c0_4 = arith.constant 0 : index
    %3 = vector.load %arg3[%c0_3, %c0_4] : memref<1x512xf32, #tpu.memory_space<vmem>>, vector<1x512xf32>
    %4 = vector.broadcast %3 : vector<1x512xf32> to vector<8x512xf32>
    %5 = arith.addf %2, %4 : vector<8x512xf32>
    %cst_5 = arith.constant 0.000000e+00 : f32
    %6 = vector.broadcast %cst_5 : f32 to vector<8x512xf32>
    %7 = arith.maximumf %5, %6 : vector<8x512xf32>
    %8 = arith.truncf %7 : vector<8x512xf32> to vector<8x512xbf16>
    %c0_6 = arith.constant 0 : index
    %c0_7 = arith.constant 0 : index
    %9 = vector.load %arg4[%c0_6, %c0_7] : memref<512x512xbf16, #tpu.memory_space<vmem>>, vector<512x512xbf16>
    %cst_8 = arith.constant dense<0.000000e+00> : vector<8x512xf32>
    %10 = tpu.matmul %8, %9, %cst_8 {dimension_numbers = #tpu.dot_dimension_numbers<[1], [0], [0], [1], [0, 0, 1, 1], [], []>} : vector<8x512xbf16>, vector<512x512xbf16>, vector<8x512xf32> -> vector<8x512xf32>
    %c0_9 = arith.constant 0 : index
    %c0_10 = arith.constant 0 : index
    %11 = vector.load %arg5[%c0_9, %c0_10] : memref<8x512xf32, #tpu.memory_space<vmem>>, vector<8x512xf32>
    tpu.vector_store %arg5[%c0_9, %c0_10], %10 {strides = array<i32>} : memref<8x512xf32, #tpu.memory_space<vmem>>, vector<8x512xf32>,
    %cst_11 = arith.constant dense<0.000000e+00> : vector<512xf32>
    %12 = vector.multi_reduction <add>, %10, %cst_11 [0] : vector<8x512xf32> to vector<512xf32>
    %13 = vector.shape_cast %12 : vector<512xf32> to vector<1x512xf32>
    %14 = arith.mulf %10, %10 : vector<8x512xf32>
    %cst_12 = arith.constant dense<0.000000e+00> : vector<512xf32>
    %15 = vector.multi_reduction <add>, %14, %cst_12 [0] : vector<8x512xf32> to vector<512xf32>
    %16 = vector.shape_cast %15 : vector<512xf32> to vector<1x512xf32>
    %cst_13 = arith.constant 0.000000e+00 : f32
    %17 = vector.broadcast %cst_13 : f32 to vector<6x512xf32>
    %18 = tpu.concatenate %13, %16, %17 in 0 : vector<1x512xf32>, vector<1x512xf32>, vector<6x512xf32> -> vector<8x512xf32>
    %19 = vector.shape_cast %18 : vector<8x512xf32> to vector<1x8x512xf32>
    %c0_14 = arith.constant 0 : index
    %c0_15 = arith.constant 0 : index
    %c0_16 = arith.constant 0 : index
    %20 = vector.load %arg6[%c0_14, %c0_15, %c0_16] : memref<1x8x512xf32, #tpu.memory_space<vmem>>, vector<1x8x512xf32>
    tpu.vector_store %arg6[%c0_14, %c0_15, %c0_16], %19 {strides = array<i32>} : memref<1x8x512xf32, #tpu.memory_space<vmem>>, vector<1x8x512xf32>,
    return
  }
  func.func @transform_0(%arg0: i32) -> (i32, i32) {
    %c0_i32 = arith.constant 0 : i32
    %c0_i32_0 = arith.constant 0 : i32
    return %arg0, %c0_i32 : i32, i32
  }
  func.func @transform_1(%arg0: i32) -> (i32, i32) {
    %c0_i32 = arith.constant 0 : i32
    %c0_i32_0 = arith.constant 0 : i32
    %c0_i32_1 = arith.constant 0 : i32
    return %c0_i32, %c0_i32_0 : i32, i32
  }
  func.func @transform_2(%arg0: i32) -> (i32, i32) {
    %c0_i32 = arith.constant 0 : i32
    %c0_i32_0 = arith.constant 0 : i32
    %c0_i32_1 = arith.constant 0 : i32
    return %c0_i32, %c0_i32_0 : i32, i32
  }
  func.func @transform_3(%arg0: i32) -> (i32, i32) {
    %c0_i32 = arith.constant 0 : i32
    %c0_i32_0 = arith.constant 0 : i32
    %c0_i32_1 = arith.constant 0 : i32
    return %c0_i32, %c0_i32_0 : i32, i32
  }
  func.func @transform_4(%arg0: i32) -> (i32, i32) {
    %c0_i32 = arith.constant 0 : i32
    %c0_i32_0 = arith.constant 0 : i32
    return %arg0, %c0_i32 : i32, i32
  }
  func.func @transform_5(%arg0: i32) -> (i32, i32, i32) {
    %c0_i32 = arith.constant 0 : i32
    %c0_i32_0 = arith.constant 0 : i32
    %c0_i32_1 = arith.constant 0 : i32
    return %arg0, %c0_i32, %c0_i32_0 : i32, i32, i32
  }
}

</mosaic_0001>

<bundles_post_ra>
// kernel: tpu_custom_call.1
= control target key start
LH: loop header
LB: loop body
LE: loop exit
PB: predicated region body
PF: predicated region fallthrough
CT: control target
= control target key end

     0   :  { %11 = vsyncpa [#allocation3], 0  ;;  %s1937_s0 = inlined_call_operand.hbm [shape: bf16[8,64], index: 0, kind: input, shape index: {}]   ;;  %s1938_s1 = inlined_call_operand.hbm [shape: bf16[64,512], index: 1, kind: input, shape index: {}]   ;;  %s1939_s2 = inlined_call_operand.vmem [shape: f32[1,512], index: 2, kind: input, shape index: {}]   ;;  %s1940_s3 = inlined_call_operand.hbm [shape: bf16[512,512], index: 3, kind: input, shape index: {}]   ;;  %s1941_s4 = inlined_call_operand.hbm [shape: f32[8,512], index: 4, kind: output, shape index: {0}]   ;;  %s1942_s5 = inlined_call_operand.hbm [shape: f32[1,8,512], index: 5, kind: output, shape index: {1}]  }
   0x1   :  { %12 = vsyncpa [#allocation6], 0 }
   0x2   :  { %13 = vsyncpa [#allocation4], 0 }
   0x3   :  { %14 = vsyncpa [#allocation10], 0  ;;  %s1802_s18 = smov [#allocation5]   ;;  %s1684_s22 = scalar_lea.hbm %s1938_s1, 2048 }
   0x4   :  { %s30_s19 = sshll.u32 %s1802_s18, 4  ;;  %p1685_p0 = scmp.ne.s32.totalorder %s1938_s1, %s1684_s22  ;;  %s31_s19 = int_to_ptr.vmem [resolvable:$true] %s30_s19 }
   0x5   :  { %p1688_p1 = scmp.lt.u32.totalorder %s1684_s22, %s1938_s1 }
   0x7   :  { %p1690_p2 = pnand %p1688_p1, %p1685_p0 }
   0x9   :  { %1693 = shalt.err (!%p1690_p2)
}
   0xa   :  { %s1694_s27 = scalar_lea.vmem %s31_s19, 2048  ;;  %p1699_p4 = scmp.lt.s32.totalorder %s31_s19, %s31_s19 }
   0xb   :  { %p1695_p3 = scmp.ne.s32.totalorder %s31_s19, %s1694_s27  ;;  %p1700_p5 = scmp.lt.s32.totalorder %s1694_s27, %s1694_s27 }
   0xd   :  { %p1701_p6 = por %p1700_p5, %p1699_p4 }
   0xf   :  { %p1702_p7 = pnand %p1701_p6, %p1695_p3 }
  0x11   :  { %1705 = shalt.err (!%p1702_p7)
}
  0x12   :  { %s1803_s28 = smov 256   ;;  %s1804_s29 = smov 16  }
  0x13   :  { %36 = dma.hbm_to_vmem [thread:$0]  %s1938_s1, 2048, %s31_s19, [#allocation6], %s1803_s28, %s1803_s28, %s1804_s29  }
  0x14   :  { %s1805_s7 = smov [#allocation2]   ;;  %s1806_s9 = smov [#allocation7]  }
  0x15   :  { %s21_s8 = sshll.u32 %s1805_s7, 4  ;;  %s44_s10 = sshll.u32 %s1806_s9, 4  ;;  %s22_s8 = int_to_ptr.vmem [resolvable:$true] %s21_s8  ;;  %s45_s10 = int_to_ptr.vmem [resolvable:$true] %s44_s10 }
  0x16   :  { %s1706_s13 = scalar_lea.hbm %s1937_s0, 64 }
  0x17   :  { %p1707_p8 = scmp.ne.s32.totalorder %s1937_s0, %s1706_s13  ;;  %p1710_p9 = scmp.lt.u32.totalorder %s1706_s13, %s1937_s0 }
  0x19   :  { %p1712_p10 = pnand %p1710_p9, %p1707_p8 }
  0x1b   :  { %1715 = shalt.err (!%p1712_p10)
}
  0x1c   :  { %s1716_s1 = scalar_lea.vmem %s22_s8, 64  ;;  %p1721_p12 = scmp.lt.s32.totalorder %s22_s8, %s22_s8 }
  0x1d   :  { %p1717_p11 = scmp.ne.s32.totalorder %s22_s8, %s1716_s1  ;;  %p1722_p13 = scmp.lt.s32.totalorder %s1716_s1, %s1716_s1 }
  0x1f   :  { %p1723_p0 = por %p1722_p13, %p1721_p12 }
  0x21   :  { %p1724_p1 = pnand %p1723_p0, %p1717_p11 }
  0x23   :  { %1727 = shalt.err (!%p1724_p1)
}
  0x24   :  { %24 = dma.hbm_to_vmem [thread:$0]  %s1937_s0, 64, %s22_s8, [#allocation3]  }
  0x25   :  { %s1728_s22 = scalar_lea.hbm %s1940_s3, 16384 }
  0x26   :  { %p1729_p2 = scmp.ne.s32.totalorder %s1940_s3, %s1728_s22  ;;  %p1732_p3 = scmp.lt.u32.totalorder %s1728_s22, %s1940_s3 }
  0x28   :  { %p1734_p4 = pnand %p1732_p3, %p1729_p2 }
  0x2a   :  { %1737 = shalt.err (!%p1734_p4)
}
  0x2b   :  { %s1738_s27 = scalar_lea.vmem %s45_s10, 16384  ;;  %p1743_p6 = scmp.lt.s32.totalorder %s45_s10, %s45_s10 }
  0x2c   :  { %p1739_p5 = scmp.ne.s32.totalorder %s45_s10, %s1738_s27  ;;  %p1744_p7 = scmp.lt.s32.totalorder %s1738_s27, %s1738_s27 }
  0x2e   :  { %p1745_p8 = por %p1744_p7, %p1743_p6 }
  0x30   :  { %p1746_p9 = pnand %p1745_p8, %p1739_p5 }
  0x32   :  { %1749 = shalt.err (!%p1746_p9)
}
  0x33   :  { %50 = dma.hbm_to_vmem [thread:$0]  %s1940_s3, 16384, %s45_s10, [#allocation6], %s1803_s28, %s1803_s28, %s1804_s29  }
  0x34   :  { %1794 = dma.done.wait [#allocation3], 64  }
  0x35   :  { %1795 = vsyncadd [#allocation3], 4294967232 }
  0x36   :  { %1796 = dma.done.wait [#allocation6], 18432  }
  0x37   :  { %1797 = vsyncadd [#allocation6], 4294948864  ;;  %v1807_v0 = vmov 0   ;;  %v1468_v1 = vld [vmem:[#allocation5 + $0x4] ss:$16 sps:$4 sm:$0xff]   ;;  %vm180_vm0 = vcmask 523264  }
  0x38   :  { %216 = vmatprep.mubr.bf16.mxu0 %v1807_v0  ;;  %257 = vmatprep.mubr.bf16.mxu1 %v1807_v0  ;;  %v1470_v2 = vld [vmem:[#allocation5] ss:$16 sps:$4 sm:$0xff]   ;;  %v1471_v3 = vld [vmem:[#allocation5 + $0x24] ss:$16 sps:$4 sm:$0xff]   ;;  %v1480_v7 = vld [vmem:[#allocation5 + $0xc] ss:$16 sps:$4 sm:$0xff]  }
  0x39   :  { %184 = vmatprep.subr.bf16.mxu0 %v1468_v1  ;;  %v1473_v4 = vld [vmem:[#allocation5 + $0x20] ss:$16 sps:$4 sm:$0xff]   ;;  %v1474_v5 = vld [vmem:[#allocation5 + $0x44] ss:$16 sps:$4 sm:$0xff]   ;;  %v1482_v8 = vld [vmem:[#allocation5 + $0x8] ss:$16 sps:$4 sm:$0xff]   ;;  %225 = vmatprep.subr.bf16.mxu1 %v1480_v7 }
  0x3a   :  { %185 = vmatpush1.bf16.msra.mxu0 %v1470_v2  ;;  %v1476_v6 = vld [vmem:[#allocation5 + $0x40] ss:$16 sps:$4 sm:$0xff]   ;;  %v1483_v9 = vld [vmem:[#allocation5 + $0x2c] ss:$16 sps:$4 sm:$0xff]   ;;  %v1477_v10 = vld [vmem:[#allocation5 + $0x64] ss:$16 sps:$4 sm:$0xff]   ;;  %226 = vmatpush1.bf16.msra.mxu1 %v1482_v8 }
  0x3b   :  { %186 = vmatprep.subr.bf16.mxu0 %v1471_v3  ;;  %v1485_v11 = vld [vmem:[#allocation5 + $0x28] ss:$16 sps:$4 sm:$0xff]   ;;  %227 = vmatprep.subr.bf16.mxu1 %v1483_v9  ;;  %v1486_v12 = vld [vmem:[#allocation5 + $0x4c] ss:$16 sps:$4 sm:$0xff]   ;;  %v1479_v13 = vld [vmem:[#allocation5 + $0x60] ss:$16 sps:$4 sm:$0xff]  }
  0x3c   :  { %v1494_v14 = vld [vmem:[#allocation7 + $0x4] ss:$16 sps:$4 sm:$0xff]   ;;  %v1488_v15 = vld [vmem:[#allocation5 + $0x48] ss:$16 sps:$4 sm:$0xff]   ;;  %v61_v16 = vld [vmem:[#allocation2] sm:$0xf] }
  0x3d   :  { %v1489_v17 = vld [vmem:[#allocation5 + $0x6c] ss:$16 sps:$4 sm:$0xff]   ;;  %v1492_v18 = vld [vmem:[#allocation7] ss:$16 sps:$4 sm:$0xff]   ;;  %v1500_v19 = vld [vmem:[#allocation7 + $0x24] ss:$16 sps:$4 sm:$0xff]  }
  0x3e   :  { %187 = vmatpush1.bf16.msra.mxu0 %v1473_v4  ;;  %228 = vmatpush1.bf16.msra.mxu1 %v1485_v11  ;;  %v1491_v20 = vld [vmem:[#allocation5 + $0x68] ss:$16 sps:$4 sm:$0xff]   ;;  %v1497_v21 = vld [vmem:[#allocation7 + $0xc] ss:$16 sps:$4 sm:$0xff]   ;;  %v1498_v22 = vld [vmem:[#allocation7 + $0x20] ss:$16 sps:$4 sm:$0xff]  }
  0x3f   :  { %188 = vmatprep.subr.bf16.mxu0 %v1474_v5  ;;  %229 = vmatprep.subr.bf16.mxu1 %v1486_v12  ;;  %v1506_v23 = vld [vmem:[#allocation7 + $0x44] ss:$16 sps:$4 sm:$0xff]   ;;  %v1495_v24 = vld [vmem:[#allocation7 + $0x8] ss:$16 sps:$4 sm:$0xff]   ;;  %v1503_v25 = vld [vmem:[#allocation7 + $0x2c] ss:$16 sps:$4 sm:$0xff]  }
  0x40   :  { %v1504_v26 = vld [vmem:[#allocation7 + $0x40] ss:$16 sps:$4 sm:$0xff]   ;;  %v1512_v27 = vld [vmem:[#allocation7 + $0x64] ss:$16 sps:$4 sm:$0xff]   ;;  %v1501_v28 = vld [vmem:[#allocation7 + $0x28] ss:$16 sps:$4 sm:$0xff]  }
  0x41   :  { %v1509_v29 = vld [vmem:[#allocation7 + $0x4c] ss:$16 sps:$4 sm:$0xff]   ;;  %v1510_v30 = vld [vmem:[#allocation7 + $0x60] ss:$16 sps:$4 sm:$0xff]   ;;  %v1518_v31 = vld [vmem:[#allocation7 + $0x84] ss:$16 sps:$4 sm:$0xff]  }
  0x42   :  { %189 = vmatpush1.bf16.msra.mxu0 %v1476_v6  ;;  %230 = vmatpush1.bf16.msra.mxu1 %v1488_v15  ;;  %v1507_v32 = vld [vmem:[#allocation7 + $0x48] ss:$16 sps:$4 sm:$0xff]   ;;  %v1515_v33 = vld [vmem:[#allocation7 + $0x6c] ss:$16 sps:$4 sm:$0xff]   ;;  %v1516_v34 = vld [vmem:[#allocation7 + $0x80] ss:$16 sps:$4 sm:$0xff]  }
  0x43   :  { %190 = vmatprep.subr.bf16.mxu0 %v1477_v10  ;;  %231 = vmatprep.subr.bf16.mxu1 %v1489_v17  ;;  %v1524_v35 = vld [vmem:[#allocation7 + $0xa4] ss:$16 sps:$4 sm:$0xff]   ;;  %v1513_v36 = vld [vmem:[#allocation7 + $0x68] ss:$16 sps:$4 sm:$0xff]   ;;  %v1521_v37 = vld [vmem:[#allocation7 + $0x8c] ss:$16 sps:$4 sm:$0xff]  }
  0x44   :  { %v1522_v38 = vld [vmem:[#allocation7 + $0xa0] ss:$16 sps:$4 sm:$0xff]   ;;  %v1530_v39 = vld [vmem:[#allocation7 + $0xc4] ss:$16 sps:$4 sm:$0xff]   ;;  %v1519_v40 = vld [vmem:[#allocation7 + $0x88] ss:$16 sps:$4 sm:$0xff]  }
  0x45   :  { %v1527_v41 = vld [vmem:[#allocation7 + $0xac] ss:$16 sps:$4 sm:$0xff]   ;;  %v1528_v42 = vld [vmem:[#allocation7 + $0xc0] ss:$16 sps:$4 sm:$0xff]   ;;  %v1536_v43 = vld [vmem:[#allocation7 + $0xe4] ss:$16 sps:$4 sm:$0xff]  }
  0x46   :  { %191 = vmatpush1.bf16.msra.mxu0 %v1479_v13  ;;  %232 = vmatpush1.bf16.msra.mxu1 %v1491_v20  ;;  %v1525_v44 = vld [vmem:[#allocation7 + $0xa8] ss:$16 sps:$4 sm:$0xff]   ;;  %v1533_v45 = vld [vmem:[#allocation7 + $0xcc] ss:$16 sps:$4 sm:$0xff]   ;;  %v1534_v46 = vld [vmem:[#allocation7 + $0xe0] ss:$16 sps:$4 sm:$0xff]   ;;  %v80_v20 = vlaneseq }
  0x47   :  { %1042 = vmatprep.subr.bf16.mxu0 %v1494_v14  ;;  %1124 = vmatprep.subr.bf16.mxu1 %v1497_v21  ;;  %v1542_v47 = vld [vmem:[#allocation7 + $0x104] ss:$16 sps:$4 sm:$0xff]   ;;  %v1531_v48 = vld [vmem:[#allocation7 + $0xc8] ss:$16 sps:$4 sm:$0xff]   ;;  %v1539_v49 = vld [vmem:[#allocation7 + $0xec] ss:$16 sps:$4 sm:$0xff]  }
  0x48   :  { %v1537_v50 = vld [vmem:[#allocation7 + $0xe8] ss:$16 sps:$4 sm:$0xff]   ;;  %v1540_v51 = vld [vmem:[#allocation7 + $0x100] ss:$16 sps:$4 sm:$0xff]   ;;  %v1545_v52 = vld [vmem:[#allocation7 + $0x10c] ss:$16 sps:$4 sm:$0xff]  }
  0x49   :  { %1322 = vmatmul.mubr.msk.bf16.vlgmr.msra.gmra.mrb[0].mxu0 %vm180_vm0, %v61_v16  ;;  %1323 = vmatmul.mubr.msk.bf16.vlgmr.msra.gmra.mrb[0].mxu1 %vm180_vm0, %v61_v16  ;;  %v1548_v53 = vld [vmem:[#allocation7 + $0x124] ss:$16 sps:$4 sm:$0xff]   ;;  %v1546_v54 = vld [vmem:[#allocation7 + $0x120] ss:$16 sps:$4 sm:$0xff]   ;;  %v1543_v56 = vld [vmem:[#allocation7 + $0x108] ss:$16 sps:$4 sm:$0xff]  }
  0x4a   :  { %1043 = vmatpush1.bf16.msra.mxu0 %v1492_v18  ;;  %1125 = vmatpush1.bf16.msra.mxu1 %v1495_v24  ;;  %v1554_v55 = vld [vmem:[#allocation7 + $0x144] ss:$16 sps:$4 sm:$0xff]   ;;  %v1551_v57 = vld [vmem:[#allocation7 + $0x12c] ss:$16 sps:$4 sm:$0xff]   ;;  %v1552_v58 = vld [vmem:[#allocation7 + $0x140] ss:$16 sps:$4 sm:$0xff]  }
  0x4b   :  { %1044 = vmatprep.subr.bf16.mxu0 %v1500_v19  ;;  %1126 = vmatprep.subr.bf16.mxu1 %v1503_v25  ;;  %v1560_v59 = vld [vmem:[#allocation7 + $0x164] ss:$16 sps:$4 sm:$0xff]   ;;  %v1549_v60 = vld [vmem:[#allocation7 + $0x128] ss:$16 sps:$4 sm:$0xff]   ;;  %v1557_v61 = vld [vmem:[#allocation7 + $0x14c] ss:$16 sps:$4 sm:$0xff]  }
  0x4c   :  { %v1558_v62 = vld [vmem:[#allocation7 + $0x160] ss:$16 sps:$4 sm:$0xff]   ;;  %v1566_v63 = vld [vmem:[#allocation7 + $0x184] ss:$16 sps:$4 sm:$0xff]   ;;  %v1555_v0 = vld [vmem:[#allocation7 + $0x148] ss:$16 sps:$4 sm:$0xff]  }
  0x4d   :  { %v1563_v1 = vld [vmem:[#allocation7 + $0x16c] ss:$16 sps:$4 sm:$0xff]   ;;  %v1564_v2 = vld [vmem:[#allocation7 + $0x180] ss:$16 sps:$4 sm:$0xff]   ;;  %v1572_v3 = vld [vmem:[#allocation7 + $0x1a4] ss:$16 sps:$4 sm:$0xff]  }
  0x4e   :  { %1045 = vmatpush1.bf16.msra.mxu0 %v1498_v22  ;;  %1127 = vmatpush1.bf16.msra.mxu1 %v1501_v28  ;;  %v1561_v4 = vld [vmem:[#allocation7 + $0x168] ss:$16 sps:$4 sm:$0xff]   ;;  %v1569_v5 = vld [vmem:[#allocation7 + $0x18c] ss:$16 sps:$4 sm:$0xff]   ;;  %v1570_v6 = vld [vmem:[#allocation7 + $0x1a0] ss:$16 sps:$4 sm:$0xff]  }
  0x4f   :  { %1046 = vmatprep.subr.bf16.mxu0 %v1506_v23  ;;  %1128 = vmatprep.subr.bf16.mxu1 %v1509_v29  ;;  %v1567_v7 = vld [vmem:[#allocation7 + $0x188] ss:$16 sps:$4 sm:$0xff]   ;;  %v1575_v8 = vld [vmem:[#allocation7 + $0x1ac] ss:$16 sps:$4 sm:$0xff]   ;;  %v1578_v10 = vld [vmem:[#allocation7 + $0x1c4] ss:$16 sps:$4 sm:$0xff]  }
  0x50   :  { %v1573_v9 = vld [vmem:[#allocation7 + $0x1a8] ss:$16 sps:$4 sm:$0xff]   ;;  %v1581_v11 = vld [vmem:[#allocation7 + $0x1cc] ss:$16 sps:$4 sm:$0xff]   ;;  %v1576_v12 = vld [vmem:[#allocation7 + $0x1c0] ss:$16 sps:$4 sm:$0xff]  }
  0x51   :  { %v1579_v13 = vld [vmem:[#allocation7 + $0x1c8] ss:$16 sps:$4 sm:$0xff]   ;;  %v1584_v14 = vld [vmem:[#allocation7 + $0x1e4] ss:$16 sps:$4 sm:$0xff]   ;;  %v1587_v15 = vld [vmem:[#allocation7 + $0x1ec] ss:$16 sps:$4 sm:$0xff]  }
  0x52   :  { %1047 = vmatpush1.bf16.msra.mxu0 %v1504_v26  ;;  %1129 = vmatpush1.bf16.msra.mxu1 %v1507_v32  ;;  %v1582_v16 = vld [vmem:[#allocation7 + $0x1e0] ss:$16 sps:$4 sm:$0xff]   ;;  %v1585_v17 = vld [vmem:[#allocation7 + $0x1e8] ss:$16 sps:$4 sm:$0xff]   ;;  %v1590_v18 = vld [vmem:[#allocation7 + $0x204] ss:$16 sps:$4 sm:$0xff]  }
  0x53   :  { %1048 = vmatprep.subr.bf16.mxu0 %v1512_v27  ;;  %1130 = vmatprep.subr.bf16.mxu1 %v1515_v33  ;;  %v1593_v19 = vld [vmem:[#allocation7 + $0x20c] ss:$16 sps:$4 sm:$0xff]   ;;  %v1884_v21 = vshrl.u32 %v80_v20, 7  ;;  %v1650_v20 = vld [vmem:[#allocation7 + $0x344] ss:$16 sps:$4 sm:$0xff]  }
  0x54   :  { %v1890_v23 = vld [vmem:[%s1939_s2] sm:$0xf]  ;;  %s1808_s2 = smov [#allocation8]  }
  0x55   :  { %v82_v22 = vsub.s32 0, %v1884_v21  ;;  %v86_v24 = vsub.s32 1, %v1884_v21  ;;  %v94_v28 = vsub.s32 3, %v1884_v21  ;;  %s1282_s29 = sshll.u32 %s1808_s2, 4  ;;  %s1902_s29 = int_to_ptr.vmem [resolvable:$true] %s1282_s29 }
  0x56   :  { %1049 = vmatpush1.bf16.msra.mxu0 %v1510_v30  ;;  %1131 = vmatpush1.bf16.msra.mxu1 %v1513_v36  ;;  %s1750_s6 = scalar_lea.vmem %s1902_s29, 512  ;;  %p1755_p11 = scmp.lt.s32.totalorder %s1902_s29, %s1902_s29 }
  0x57   :  { %1050 = vmatprep.subr.bf16.mxu0 %v1518_v31  ;;  %1132 = vmatprep.subr.bf16.mxu1 %v1521_v37  ;;  %v83_v25 = vrot.slane %v1890_v23, %v82_v22  ;;  %v87_v26 = vrot.slane %v1890_v23, %v86_v24  ;;  %v95_v36 = vrot.slane %v1890_v23, %v94_v28  ;;  %v1653_v22 = vld [vmem:[#allocation7 + $0x34c] ss:$16 sps:$4 sm:$0xff]   ;;  %v1648_v24 = vld [vmem:[#allocation7 + $0x340] ss:$16 sps:$4 sm:$0xff]   ;;  %p1751_p10 = scmp.ne.s32.totalorder %s1902_s29, %s1750_s6  ;;  %p1756_p12 = scmp.lt.s32.totalorder %s1750_s6, %s1750_s6 }
  0x58   :  { %v1654_v28 = vld [vmem:[#allocation7 + $0x360] ss:$16 sps:$4 sm:$0xff]  }
  0x59   :  { %p1757_p13 = por %p1756_p12, %p1755_p11 }
  0x5a   :  { %1051 = vmatpush1.bf16.msra.mxu0 %v1516_v34  ;;  %1133 = vmatpush1.bf16.msra.mxu1 %v1519_v40 }
  0x5b   :  { %1052 = vmatprep.subr.bf16.mxu0 %v1524_v35  ;;  %1134 = vmatprep.subr.bf16.mxu1 %v1527_v41  ;;  %p1758_p0 = pnand %p1757_p13, %p1751_p10 }
  0x5e   :  { %1053 = vmatpush1.bf16.msra.mxu0 %v1522_v38  ;;  %1135 = vmatpush1.bf16.msra.mxu1 %v1525_v44  ;;  %v1588_v38 = vld [vmem:[#allocation7 + $0x200] ss:$16 sps:$4 sm:$0xff]  }
  0x5f   :  { %1054 = vmatprep.subr.bf16.mxu0 %v1530_v39  ;;  %1136 = vmatprep.subr.bf16.mxu1 %v1533_v45  ;;  %v1591_v39 = vld [vmem:[#allocation7 + $0x208] ss:$16 sps:$4 sm:$0xff]  }
  0x62   :  { %1055 = vmatpush1.bf16.msra.mxu0 %v1528_v42  ;;  %1137 = vmatpush1.bf16.msra.mxu1 %v1531_v48  ;;  %v1596_v42 = vld [vmem:[#allocation7 + $0x224] ss:$16 sps:$4 sm:$0xff]   ;;  %v1594_v48 = vld [vmem:[#allocation7 + $0x220] ss:$16 sps:$4 sm:$0xff]  }
  0x63   :  { %1056 = vmatprep.subr.bf16.mxu0 %v1536_v43  ;;  %1138 = vmatprep.subr.bf16.mxu1 %v1539_v49  ;;  %v1599_v43 = vld [vmem:[#allocation7 + $0x22c] ss:$16 sps:$4 sm:$0xff]   ;;  %v1597_v49 = vld [vmem:[#allocation7 + $0x228] ss:$16 sps:$4 sm:$0xff]  }
  0x66   :  { %1057 = vmatpush1.bf16.msra.mxu0 %v1534_v46  ;;  %1139 = vmatpush1.bf16.msra.mxu1 %v1537_v50 }
  0x67   :  { %1058 = vmatprep.subr.bf16.mxu0 %v1542_v47  ;;  %1140 = vmatprep.subr.bf16.mxu1 %v1545_v52  ;;  %v1605_v52 = vld [vmem:[#allocation7 + $0x24c] ss:$16 sps:$4 sm:$0xff]  }
  0x6a   :  { %1059 = vmatpush1.bf16.msra.mxu0 %v1540_v51  ;;  %1141 = vmatpush1.bf16.msra.mxu1 %v1543_v56  ;;  %v1602_v51 = vld [vmem:[#allocation7 + $0x244] ss:$16 sps:$4 sm:$0xff]  }
  0x6b   :  { %1060 = vmatprep.subr.bf16.mxu0 %v1548_v53  ;;  %1142 = vmatprep.subr.bf16.mxu1 %v1551_v57  ;;  %v1608_v56 = vld [vmem:[#allocation7 + $0x264] ss:$16 sps:$4 sm:$0xff]   ;;  %v1611_v57 = vld [vmem:[#allocation7 + $0x26c] ss:$16 sps:$4 sm:$0xff]  }
  0x6e   :  { %1061 = vmatpush1.bf16.msra.mxu0 %v1546_v54  ;;  %1143 = vmatpush1.bf16.msra.mxu1 %v1549_v60  ;;  %v1600_v54 = vld [vmem:[#allocation7 + $0x240] ss:$16 sps:$4 sm:$0xff]   ;;  %v1614_v60 = vld [vmem:[#allocation7 + $0x284] ss:$16 sps:$4 sm:$0xff]  }
  0x6f   :  { %1062 = vmatprep.subr.bf16.mxu0 %v1554_v55  ;;  %1144 = vmatprep.subr.bf16.mxu1 %v1557_v61  ;;  %v1603_v55 = vld [vmem:[#allocation7 + $0x248] ss:$16 sps:$4 sm:$0xff]   ;;  %v1617_v61 = vld [vmem:[#allocation7 + $0x28c] ss:$16 sps:$4 sm:$0xff]  }
  0x72   :  { %1063 = vmatpush1.bf16.msra.mxu0 %v1552_v58  ;;  %1145 = vmatpush1.bf16.msra.mxu1 %v1555_v0  ;;  %v1606_v58 = vld [vmem:[#allocation7 + $0x260] ss:$16 sps:$4 sm:$0xff]   ;;  %v1620_v0 = vld [vmem:[#allocation7 + $0x2a4] ss:$16 sps:$4 sm:$0xff]  }
  0x73   :  { %1064 = vmatprep.subr.bf16.mxu0 %v1560_v59  ;;  %1146 = vmatprep.subr.bf16.mxu1 %v1563_v1  ;;  %v1609_v59 = vld [vmem:[#allocation7 + $0x268] ss:$16 sps:$4 sm:$0xff]   ;;  %v1623_v1 = vld [vmem:[#allocation7 + $0x2ac] ss:$16 sps:$4 sm:$0xff]  }
  0x76   :  { %1065 = vmatpush1.bf16.msra.mxu0 %v1558_v62  ;;  %1147 = vmatpush1.bf16.msra.mxu1 %v1561_v4  ;;  %v1612_v62 = vld [vmem:[#allocation7 + $0x280] ss:$16 sps:$4 sm:$0xff]   ;;  %v1626_v4 = vld [vmem:[#allocation7 + $0x2c4] ss:$16 sps:$4 sm:$0xff]  }
  0x77   :  { %1066 = vmatprep.subr.bf16.mxu0 %v1566_v63  ;;  %1148 = vmatprep.subr.bf16.mxu1 %v1569_v5  ;;  %v1615_v63 = vld [vmem:[#allocation7 + $0x288] ss:$16 sps:$4 sm:$0xff]   ;;  %v1629_v5 = vld [vmem:[#allocation7 + $0x2cc] ss:$16 sps:$4 sm:$0xff]  }
  0x7a   :  { %1067 = vmatpush1.bf16.msra.mxu0 %v1564_v2  ;;  %1149 = vmatpush1.bf16.msra.mxu1 %v1567_v7  ;;  %v1618_v2 = vld [vmem:[#allocation7 + $0x2a0] ss:$16 sps:$4 sm:$0xff]   ;;  %v1627_v7 = vld [vmem:[#allocation7 + $0x2c8] ss:$16 sps:$4 sm:$0xff]  }
  0x7b   :  { %1068 = vmatprep.subr.bf16.mxu0 %v1572_v3  ;;  %1150 = vmatprep.subr.bf16.mxu1 %v1575_v8  ;;  %v1621_v3 = vld [vmem:[#allocation7 + $0x2a8] ss:$16 sps:$4 sm:$0xff]   ;;  %v1632_v8 = vld [vmem:[#allocation7 + $0x2e4] ss:$16 sps:$4 sm:$0xff]  }
  0x7e   :  { %1069 = vmatpush1.bf16.msra.mxu0 %v1570_v6  ;;  %1151 = vmatpush1.bf16.msra.mxu1 %v1573_v9  ;;  %v1624_v6 = vld [vmem:[#allocation7 + $0x2c0] ss:$16 sps:$4 sm:$0xff]   ;;  %v1635_v9 = vld [vmem:[#allocation7 + $0x2ec] ss:$16 sps:$4 sm:$0xff]  }
  0x7f   :  { %1070 = vmatprep.subr.bf16.mxu0 %v1578_v10  ;;  %1152 = vmatprep.subr.bf16.mxu1 %v1581_v11  ;;  %v1630_v10 = vld [vmem:[#allocation7 + $0x2e0] ss:$16 sps:$4 sm:$0xff]   ;;  %v1633_v11 = vld [vmem:[#allocation7 + $0x2e8] ss:$16 sps:$4 sm:$0xff]  }
  0x82   :  { %1071 = vmatpush1.bf16.msra.mxu0 %v1576_v12  ;;  %1153 = vmatpush1.bf16.msra.mxu1 %v1579_v13  ;;  %v1638_v12 = vld [vmem:[#allocation7 + $0x304] ss:$16 sps:$4 sm:$0xff]   ;;  %v1641_v13 = vld [vmem:[#allocation7 + $0x30c] ss:$16 sps:$4 sm:$0xff]  }
  0x83   :  { %1072 = vmatprep.subr.bf16.mxu0 %v1584_v14  ;;  %1154 = vmatprep.subr.bf16.mxu1 %v1587_v15  ;;  %v1636_v14 = vld [vmem:[#allocation7 + $0x300] ss:$16 sps:$4 sm:$0xff]   ;;  %v1639_v15 = vld [vmem:[#allocation7 + $0x308] ss:$16 sps:$4 sm:$0xff]  }
  0x86   :  { %1073 = vmatpush1.bf16.msra.mxu0 %v1582_v16  ;;  %1155 = vmatpush1.bf16.msra.mxu1 %v1585_v17  ;;  %v1644_v16 = vld [vmem:[#allocation7 + $0x324] ss:$16 sps:$4 sm:$0xff]   ;;  %v1647_v17 = vld [vmem:[#allocation7 + $0x32c] ss:$16 sps:$4 sm:$0xff]  }
  0x87   :  { %1083 = vmatprep.subr.bf16.mxu0 %v1590_v18  ;;  %1165 = vmatprep.subr.bf16.mxu1 %v1593_v19  ;;  %v1642_v18 = vld [vmem:[#allocation7 + $0x320] ss:$16 sps:$4 sm:$0xff]   ;;  %v1645_v19 = vld [vmem:[#allocation7 + $0x328] ss:$16 sps:$4 sm:$0xff]  }
 0x11c   :  { %v218_v27 = vpop.f32.mrb[0].mxu0  ;;  %v1897_v40 = vpop.f32.mrb[0].mxu1 }
 0x11d   :  { %v219_v29 = vadd.f32 %v218_v27, %v83_v25  ;;  %v220_v30 = vpop.f32.mrb[1].mxu0  ;;  %v261_v44 = vpop.f32.mrb[1].mxu1  ;;  %v1651_v25 = vld [vmem:[#allocation7 + $0x348] ss:$16 sps:$4 sm:$0xff]   ;;  %v1659_v27 = vld [vmem:[#allocation7 + $0x36c] ss:$16 sps:$4 sm:$0xff]  }
 0x11e   :  { %v221_v31 = vadd.f32 %v220_v30, %v87_v26  ;;  %v222_v32 = vpop.f32.mrb[2].mxu0  ;;  %v262_v45 = vadd.f32 %v261_v44, %v95_v36  ;;  %v263_v46 = vpop.f32.mrb[2].mxu1  ;;  %v1656_v26 = vld [vmem:[#allocation7 + $0x364] ss:$16 sps:$4 sm:$0xff]   ;;  %v1671_v36 = vld [vmem:[#allocation7 + $0x3ac] ss:$16 sps:$4 sm:$0xff]  }
 0x11f   :  { %v266_v33 = vmax.f32 %v219_v29, 0.0  ;;  %v223_v34 = vpop.f32.mrb[3].mxu0  ;;  %v264_v47 = vpop.f32.mrb[3].mxu1  ;;  %v1657_v29 = vld [vmem:[#allocation7 + $0x368] ss:$16 sps:$4 sm:$0xff]  }
 0x120   :  { %v267_v35 = vmax.f32 %v221_v31, 0.0  ;;  %v269_v50 = vmax.f32 %v262_v45, 0.0  ;;  %v1662_v30 = vld [vmem:[#allocation7 + $0x384] ss:$16 sps:$4 sm:$0xff]   ;;  %v1665_v31 = vld [vmem:[#allocation7 + $0x38c] ss:$16 sps:$4 sm:$0xff]  }
 0x121   :  { %v270_v41 = vpack.c.bf16 %v266_v33, %v266_v33  ;;  %v1660_v32 = vld [vmem:[#allocation7 + $0x380] ss:$16 sps:$4 sm:$0xff]   ;;  %v1663_v33 = vld [vmem:[#allocation7 + $0x388] ss:$16 sps:$4 sm:$0xff]   ;;  %v90_v34 = vsub.s32 2, %v1884_v21 }
 0x122   :  { %v271_v37 = vpack.c.bf16 %v267_v35, %v267_v35  ;;  %v273_v53 = vpack.c.bf16 %v269_v50, %v269_v50  ;;  %v1668_v35 = vld [vmem:[#allocation7 + $0x3a4] ss:$16 sps:$4 sm:$0xff]   ;;  %v1675_v44 = vld [vmem:[#allocation7 + $0x3c8] ss:$16 sps:$4 sm:$0xff]   ;;  %v1683_v46 = vld [vmem:[#allocation7 + $0x3ec] ss:$16 sps:$4 sm:$0xff]  }
 0x123   :  { %v1680_v21 = vld [vmem:[#allocation7 + $0x3e4] ss:$16 sps:$4 sm:$0xff]   ;;  %v1678_v47 = vld [vmem:[#allocation7 + $0x3e0] ss:$16 sps:$4 sm:$0xff]  }
 0x124   :  { %1074 = vmatprep.mubr.bf16.mxu0 %v271_v37  ;;  %1156 = vmatprep.mubr.bf16.mxu1 %v271_v37  ;;  %v1666_v37 = vld [vmem:[#allocation7 + $0x3a0] ss:$16 sps:$4 sm:$0xff]  }
 0x125   :  { %1075 = vmatmul.mubr.bf16.vlgmr.msra.gmra.mrb[4].mxu0 %v270_v41  ;;  %1157 = vmatmul.mubr.bf16.vlgmr.msra.gmra.mrb[4].mxu1 %v270_v41  ;;  %v1674_v41 = vld [vmem:[#allocation7 + $0x3c4] ss:$16 sps:$4 sm:$0xff]  }
 0x126   :  { %1084 = vmatpush1.bf16.msra.mxu0 %v1588_v38  ;;  %1166 = vmatpush1.bf16.msra.mxu1 %v1591_v39  ;;  %v1669_v38 = vld [vmem:[#allocation7 + $0x3a8] ss:$16 sps:$4 sm:$0xff]   ;;  %v91_v39 = vrot.slane %v1890_v23, %v90_v34 }
 0x127   :  { %1085 = vmatprep.subr.bf16.mxu0 %v1596_v42  ;;  %1167 = vmatprep.subr.bf16.mxu1 %v1599_v43  ;;  %v1677_v42 = vld [vmem:[#allocation7 + $0x3cc] ss:$16 sps:$4 sm:$0xff]   ;;  %v1672_v43 = vld [vmem:[#allocation7 + $0x3c0] ss:$16 sps:$4 sm:$0xff]  }
 0x128   :  { %1115 = vmatprep.mubr.bf16.mxu0 %v273_v53  ;;  %1197 = vmatprep.mubr.bf16.mxu1 %v273_v53  ;;  %v260_v45 = vadd.f32 %v1897_v40, %v91_v39 }
 0x12a   :  { %1086 = vmatpush1.bf16.msra.mxu0 %v1594_v48  ;;  %1168 = vmatpush1.bf16.msra.mxu1 %v1597_v49  ;;  %v1681_v48 = vld [vmem:[#allocation7 + $0x3e8] ss:$16 sps:$4 sm:$0xff]   ;;  %v268_v49 = vmax.f32 %v260_v45, 0.0 }
 0x12b   :  { %1087 = vmatprep.subr.bf16.mxu0 %v1602_v51  ;;  %1169 = vmatprep.subr.bf16.mxu1 %v1605_v52 }
 0x12c   :  { %v272_v23 = vpack.c.bf16 %v268_v49, %v268_v49 }
 0x12e   :  { %1088 = vmatpush1.bf16.msra.mxu0 %v1600_v54  ;;  %1170 = vmatpush1.bf16.msra.mxu1 %v1603_v55 }
 0x12f   :  { %1089 = vmatprep.subr.bf16.mxu0 %v1608_v56  ;;  %1171 = vmatprep.subr.bf16.mxu1 %v1611_v57 }
 0x132   :  { %1090 = vmatpush1.bf16.msra.mxu0 %v1606_v58  ;;  %1172 = vmatpush1.bf16.msra.mxu1 %v1609_v59 }
 0x133   :  { %1091 = vmatprep.subr.bf16.mxu0 %v1614_v60  ;;  %1173 = vmatprep.subr.bf16.mxu1 %v1617_v61 }
 0x136   :  { %1092 = vmatpush1.bf16.msra.mxu0 %v1612_v62  ;;  %1174 = vmatpush1.bf16.msra.mxu1 %v1615_v63 }
 0x137   :  { %1093 = vmatprep.subr.bf16.mxu0 %v1620_v0  ;;  %1175 = vmatprep.subr.bf16.mxu1 %v1623_v1 }
 0x13a   :  { %1094 = vmatpush1.bf16.msra.mxu0 %v1618_v2  ;;  %1176 = vmatpush1.bf16.msra.mxu1 %v1621_v3 }
 0x13b   :  { %1095 = vmatprep.subr.bf16.mxu0 %v1626_v4  ;;  %1177 = vmatprep.subr.bf16.mxu1 %v1629_v5 }
 0x13e   :  { %1096 = vmatpush1.bf16.msra.mxu0 %v1624_v6  ;;  %1178 = vmatpush1.bf16.msra.mxu1 %v1627_v7 }
 0x13f   :  { %1097 = vmatprep.subr.bf16.mxu0 %v1632_v8  ;;  %1179 = vmatprep.subr.bf16.mxu1 %v1635_v9 }
 0x142   :  { %1098 = vmatpush1.bf16.msra.mxu0 %v1630_v10  ;;  %1180 = vmatpush1.bf16.msra.mxu1 %v1633_v11 }
 0x143   :  { %1099 = vmatprep.subr.bf16.mxu0 %v1638_v12  ;;  %1181 = vmatprep.subr.bf16.mxu1 %v1641_v13 }
 0x146   :  { %1100 = vmatpush1.bf16.msra.mxu0 %v1636_v14  ;;  %1182 = vmatpush1.bf16.msra.mxu1 %v1639_v15 }
 0x147   :  { %1101 = vmatprep.subr.bf16.mxu0 %v1644_v16  ;;  %1183 = vmatprep.subr.bf16.mxu1 %v1647_v17 }
 0x14a   :  { %1102 = vmatpush1.bf16.msra.mxu0 %v1642_v18  ;;  %1184 = vmatpush1.bf16.msra.mxu1 %v1645_v19 }
 0x14b   :  { %1103 = vmatprep.subr.bf16.mxu0 %v1650_v20  ;;  %1185 = vmatprep.subr.bf16.mxu1 %v1653_v22 }
 0x14e   :  { %1104 = vmatpush1.bf16.msra.mxu0 %v1648_v24  ;;  %1186 = vmatpush1.bf16.msra.mxu1 %v1651_v25 }
 0x14f   :  { %1105 = vmatprep.subr.bf16.mxu0 %v1656_v26  ;;  %1187 = vmatprep.subr.bf16.mxu1 %v1659_v27 }
 0x152   :  { %1106 = vmatpush1.bf16.msra.mxu0 %v1654_v28  ;;  %1188 = vmatpush1.bf16.msra.mxu1 %v1657_v29 }
 0x153   :  { %1107 = vmatprep.subr.bf16.mxu0 %v1662_v30  ;;  %1189 = vmatprep.subr.bf16.mxu1 %v1665_v31 }
 0x156   :  { %1108 = vmatpush1.bf16.msra.mxu0 %v1660_v32  ;;  %1190 = vmatpush1.bf16.msra.mxu1 %v1663_v33 }
 0x157   :  { %1109 = vmatprep.subr.bf16.mxu0 %v1668_v35  ;;  %1191 = vmatprep.subr.bf16.mxu1 %v1671_v36 }
 0x15a   :  { %1110 = vmatpush1.bf16.msra.mxu0 %v1666_v37  ;;  %1192 = vmatpush1.bf16.msra.mxu1 %v1669_v38 }
 0x15b   :  { %1111 = vmatprep.subr.bf16.mxu0 %v1674_v41  ;;  %1193 = vmatprep.subr.bf16.mxu1 %v1677_v42 }
 0x15e   :  { %1112 = vmatpush1.bf16.msra.mxu0 %v1672_v43  ;;  %1194 = vmatpush1.bf16.msra.mxu1 %v1675_v44 }
 0x15f   :  { %1113 = vmatprep.subr.bf16.mxu0 %v1680_v21  ;;  %1195 = vmatprep.subr.bf16.mxu1 %v1683_v46 }
 0x162   :  { %1114 = vmatpush1.bf16.msra.mxu0 %v1678_v47  ;;  %1196 = vmatpush1.bf16.msra.mxu1 %v1681_v48 }
 0x165   :  { %1116 = vmatmul.mubr.bf16.vlgmr.msra.gmra.mrb[4].mxu0 %v272_v23  ;;  %1198 = vmatmul.mubr.bf16.vlgmr.msra.gmra.mrb[4].mxu1 %v272_v23 }
 0x238   :  { %v1117_v50 = vpop.f32.mrb[4].mxu0  ;;  %v1199_v40 = vpop.f32.mrb[4].mxu1 }
 0x239   :  { %1206 = vst [vmem:[#allocation8] sm:$0xff] %v1117_v50  ;;  %v1210_v51 = vrot.slane %v1117_v50, 4  ;;  %v1234_v52 = vmul.f32 %v1117_v50, %v1117_v50  ;;  %1208 = vst [vmem:[#allocation8 + $0x10] sm:$0xff] %v1199_v40  ;;  %v1222_v53 = vrot.slane %v1199_v40, 4  ;;  %v1236_v54 = vmul.f32 %v1199_v40, %v1199_v40  ;;  %v1119_v55 = vpop.f32.mrb[5].mxu0  ;;  %v1201_v56 = vpop.f32.mrb[5].mxu1 }
 0x23a   :  { %1207 = vst [vmem:[#allocation8 + $0x8] sm:$0xff] %v1119_v55  ;;  %v1216_v57 = vrot.slane %v1119_v55, 4  ;;  %v1235_v58 = vmul.f32 %v1119_v55, %v1119_v55  ;;  %1209 = vst [vmem:[#allocation8 + $0x18] sm:$0xff] %v1201_v56  ;;  %v1228_v59 = vrot.slane %v1201_v56, 4  ;;  %v1237_v60 = vmul.f32 %v1201_v56, %v1201_v56  ;;  %v1121_v61 = vpop.f32.mrb[6].mxu0  ;;  %v1203_v62 = vpop.f32.mrb[6].mxu1 }
 0x23b   :  { %v1211_v63 = vadd.f32 %v1210_v51, %v1117_v50  ;;  %v1238_v0 = vrot.slane %v1234_v52, 4  ;;  %v1223_v1 = vadd.f32 %v1222_v53, %v1199_v40  ;;  %v1250_v2 = vrot.slane %v1236_v54, 4  ;;  %v1122_v3 = vpop.f32.mrb[7].mxu0  ;;  %v1204_v4 = vpop.f32.mrb[7].mxu1 }
 0x23c   :  { %1761 = shalt.err (!%p1758_p0)
}
 0x23d   :  { %s1762_s9 = scalar_lea.hbm %s1941_s4, 512 }
 0x23e   :  { %p1763_p1 = scmp.ne.s32.totalorder %s1941_s4, %s1762_s9  ;;  %p1766_p2 = scmp.lt.u32.totalorder %s1762_s9, %s1941_s4 }
 0x240   :  { %p1768_p3 = pnand %p1766_p2, %p1763_p1 }
 0x242   :  { %1771 = shalt.err (!%p1768_p3)
}
 0x243   :  { %1285 = dma.vmem_to_hbm [thread:$0]  %s1902_s29, 512, %s1941_s4, [#allocation4]   ;;  %v1217_v5 = vadd.f32 %v1216_v57, %v1119_v55  ;;  %v1244_v6 = vrot.slane %v1235_v58, 4  ;;  %v1229_v7 = vadd.f32 %v1228_v59, %v1201_v56  ;;  %v1256_v8 = vrot.slane %v1237_v60, 4 }
 0x244   :  { %v1212_v9 = vrot.slane %v1211_v63, 2  ;;  %v1239_v10 = vadd.f32 %v1238_v0, %v1234_v52  ;;  %v1224_v11 = vrot.slane %v1223_v1, 2  ;;  %v1251_v12 = vadd.f32 %v1250_v2, %v1236_v54  ;;  %s1809_s4 = smov [#allocation9]  }
 0x245   :  { %v1218_v13 = vrot.slane %v1217_v5, 2  ;;  %v1245_v14 = vadd.f32 %v1244_v6, %v1235_v58  ;;  %v1230_v15 = vrot.slane %v1229_v7, 2  ;;  %v1257_v16 = vadd.f32 %v1256_v8, %v1237_v60  ;;  %s1292_s16 = sshll.u32 %s1809_s4, 4  ;;  %s1293_s16 = int_to_ptr.vmem [resolvable:$true] %s1292_s16 }
 0x246   :  { %v1213_v17 = vadd.f32 %v1212_v9, %v1211_v63  ;;  %v1240_v18 = vrot.slane %v1239_v10, 2  ;;  %v1225_v19 = vadd.f32 %v1224_v11, %v1223_v1  ;;  %v1252_v20 = vrot.slane %v1251_v12, 2  ;;  %s1772_s17 = scalar_lea.vmem %s1293_s16, 512  ;;  %p1777_p5 = scmp.lt.s32.totalorder %s1293_s16, %s1293_s16 }
 0x247   :  { %v1219_v22 = vadd.f32 %v1218_v13, %v1217_v5  ;;  %v1246_v24 = vrot.slane %v1245_v14, 2  ;;  %v1231_v25 = vadd.f32 %v1230_v15, %v1229_v7  ;;  %v1258_v26 = vrot.slane %v1257_v16, 2  ;;  %p1773_p4 = scmp.ne.s32.totalorder %s1293_s16, %s1772_s17  ;;  %p1778_p6 = scmp.lt.s32.totalorder %s1772_s17, %s1772_s17 }
 0x248   :  { %v1214_v27 = vrot.slane %v1213_v17, 1  ;;  %v1241_v28 = vadd.f32 %v1240_v18, %v1239_v10  ;;  %v1226_v29 = vrot.slane %v1225_v19, 1  ;;  %v1253_v30 = vadd.f32 %v1252_v20, %v1251_v12 }
 0x249   :  { %v1220_v31 = vrot.slane %v1219_v22, 1  ;;  %v1247_v32 = vadd.f32 %v1246_v24, %v1245_v14  ;;  %v1232_v33 = vrot.slane %v1231_v25, 1  ;;  %v1259_v34 = vadd.f32 %v1258_v26, %v1257_v16  ;;  %p1779_p7 = por %p1778_p6, %p1777_p5 }
 0x24a   :  { %v1242_v35 = vrot.slane %v1241_v28, 1  ;;  %v1254_v36 = vrot.slane %v1253_v30, 1  ;;  %vm1262_vm1 = vcmask 1040384   ;;  %vm1267_vm2 = vcmask 1041408  }
 0x24b   :  { %v1248_v37 = vrot.slane %v1247_v32, 1  ;;  %v1260_v38 = vrot.slane %v1259_v34, 1  ;;  %v1215_v39 = vadd.f32 %v1214_v27, %v1213_v17  ;;  %v1227_v42 = vadd.f32 %v1226_v29, %v1225_v19  ;;  %p1780_p8 = pnand %p1779_p7, %p1773_p4 }
 0x24c   :  { %v1243_v41 = vadd.f32 %v1242_v35, %v1241_v28  ;;  %v1255_v43 = vadd.f32 %v1254_v36, %v1253_v30  ;;  %v1221_v44 = vadd.f32 %v1220_v31, %v1219_v22  ;;  %v1233_v21 = vadd.f32 %v1232_v33, %v1231_v25 }
 0x24d   :  { %v1249_v45 = vadd.f32 %v1248_v37, %v1247_v32  ;;  %v1261_v46 = vadd.f32 %v1260_v38, %v1259_v34 }
 0x24e   :  { %v1263_v47 = vsel %vm1262_vm1, %v1215_v39, %v1243_v41  ;;  %v1265_v48 = vsel %vm1262_vm1, %v1227_v42, %v1255_v43 }
 0x24f   :  { %v1264_v49 = vsel %vm1262_vm1, %v1221_v44, %v1249_v45  ;;  %v1266_v23 = vsel %vm1262_vm1, %v1233_v21, %v1261_v46  ;;  %v1268_v50 = vsel %vm1267_vm2, %v1263_v47, 0.0  ;;  %v1270_v40 = vsel %vm1267_vm2, %v1265_v48, 0.0 }
 0x250   :  { %v1269_v51 = vsel %vm1267_vm2, %v1264_v49, 0.0  ;;  %v1271_v52 = vsel %vm1267_vm2, %v1266_v23, 0.0  ;;  %1272 = vst [vmem:[#allocation9] sm:$0xff] %v1268_v50  ;;  %1274 = vst [vmem:[#allocation9 + $0x10] sm:$0xff] %v1270_v40 }
 0x251   :  { %1273 = vst [vmem:[#allocation9 + $0x8] sm:$0xff] %v1269_v51  ;;  %1275 = vst [vmem:[#allocation9 + $0x18] sm:$0xff] %v1271_v52 }
 0x252   :  { %1783 = shalt.err (!%p1780_p8)
}
 0x253   :  { %s1784_s19 = scalar_lea.hbm %s1942_s5, 512 }
 0x254   :  { %p1785_p9 = scmp.ne.s32.totalorder %s1942_s5, %s1784_s19  ;;  %p1788_p10 = scmp.lt.u32.totalorder %s1784_s19, %s1942_s5 }
 0x256   :  { %p1790_p11 = pnand %p1788_p10, %p1785_p9 }
 0x258   :  { %1793 = shalt.err (!%p1790_p11)
}
 0x259   :  { %1295 = dma.vmem_to_hbm [thread:$0]  %s1293_s16, 512, %s1942_s5, [#allocation10]  }
 0x25a   :  { %1798 = dma.done.wait [#allocation4], 512  }
 0x25b   :  { %1799 = vsyncadd [#allocation4], 4294966784 }
 0x25c   :  { %1800 = dma.done.wait [#allocation10], 512  }
 0x25d   :  { %1801 = vsyncadd [#allocation10], 4294966784 }
 0x25e   :  { %1302 = vsyncpa [#allocation3], 1 }
 0x25f   :  { %1303 = vsyncpa [#allocation6], 1 }
 0x260   :  { %1304 = vsyncpa [#allocation4], 1 }
 0x261   :  { %1305 = vsyncpa [#allocation10], 1 }

</bundles_post_ra>
